<compile_context>
chip_gen: v5e
topology: v5e:2x2
jax: 0.10.0
libtpu: 0.0.40
codegen_flags: <defaults>
</compile_context>

<pallas_src>
import jax
import jax.numpy as jnp
from jax.experimental import pallas as pl
from jax.experimental.pallas import tpu as pltpu

_LANE = 128
_MIB = 1024 * 1024


def _round_up(n, m):
    return ((n + m - 1) // m) * m


def _sublane(itemsize):
    return {4: 8, 2: 16, 1: 32}.get(itemsize, 8)


def _vmem_budget_and_limit():
    """Generation-aware stage-2 working-set budget and scoped VMEM limit."""
    try:
        cap = pltpu.get_tpu_info().vmem_capacity_bytes
    except Exception:
        cap = 64 * _MIB                      # conservative (v7x-sized) fallback
    if cap <= 64 * _MIB:                     # v7x: 64 MiB per TensorCore
        return 20 * _MIB, 48 * _MIB
    return 48 * _MIB, 64 * _MIB              # v5e / v6e: 128 MiB


def _pick_tiles(rows, hw, itemsize, budget_bytes, max_lanes=2048, max_rows=1024):
    """Pick (row_tile, hw_tile) for the streaming gating pass.

    hw_tile is a multiple of 128; row_tile a multiple of the sublane count
    (or the full row extent when rows is tiny).  Neither needs to divide the
    array: the grid uses pl.cdiv and Pallas masks the ragged edge blocks, so
    no host-side padding / slicing (and no extra HBM traffic) is required.
    Budget covers double-buffered input + output blocks: 4 * rt * ht * itemsize.
    """
    sub = _sublane(itemsize)

    hw_tile = min(max_lanes, _round_up(hw, _LANE))
    max_hw_by_budget = (budget_bytes // (4 * sub * itemsize)) // _LANE * _LANE
    hw_tile = max(_LANE, min(hw_tile, max_hw_by_budget))

    if rows <= sub:
        row_tile = rows                      # "equals full dim" escape hatch
    else:
        by_budget = budget_bytes // (4 * hw_tile * itemsize)
        row_tile = max(sub, (by_budget // sub) * sub)
        row_tile = min(row_tile, max_rows, _round_up(rows, sub))
    return row_tile, hw_tile


def _se_gate_kernel(se_ref, w1t_ref, b1_ref, w2t_ref, b2_ref, g_ref):
    """g = sigmoid(relu(se @ W1^T + b1) @ W2^T + b2), emitted in x.dtype.

    Weights arrive pre-transposed (no in-kernel transpose); both matmuls
    accumulate in f32 regardless of the (possibly bf16) operand dtype; bias
    add, ReLU and sigmoid stay f32.
    """
    h = jnp.dot(se_ref[...], w1t_ref[...], preferred_element_type=jnp.float32)
    h = jnp.maximum(h + b1_ref[...], 0.0)
    g = jnp.dot(h.astype(w2t_ref.dtype), w2t_ref[...],
                preferred_element_type=jnp.float32) + b2_ref[...]
    g_ref[...] = jax.nn.sigmoid(g).astype(g_ref.dtype)


def _apply_gate_kernel(g_ref, x_ref, o_ref):
    """Pure elementwise gating: rows on sublanes, flattened spatial on lanes."""
    o_ref[...] = x_ref[...] * g_ref[...]     # (rt, 1) broadcast along lanes


def se_layer(x, x_se, w1, b1, w2, b2):
    """SELayer forward.

    x    : (B, C, H, W)
    x_se : (B, C, 1, 1)
    w1   : (Cmid, C)   squeezed conv_reduce 1x1 weight
    b1   : (Cmid,)
    w2   : (C, Cmid)   squeezed conv_expand 1x1 weight
    b2   : (C,)
    """
    B, C, H, W = x.shape
    Cmid = w1.shape[0]
    HW = H * W
    rows = B * C

    budget, vmem_limit = _vmem_budget_and_limit()

    # ---- Stage 1: batched SE MLP (one tiny pallas_call, full-array blocks) ----
    # bf16 MXU operands only when f32 weights would crowd scoped VMEM (large C).
    w_dtype = jnp.bfloat16 if (2 * C * Cmid * 4) > 8 * _MIB else jnp.float32
    se = x_se.reshape(B, C).astype(w_dtype)

    gate = pl.pallas_call(
        _se_gate_kernel,
        out_shape=jax.ShapeDtypeStruct((B, C), x.dtype),
        compiler_params=pltpu.CompilerParams(vmem_limit_bytes=vmem_limit),
    )(
        se,
        w1.T.astype(w_dtype),                      # (C, Cmid) pre-transposed
        b1.reshape(1, Cmid).astype(jnp.float32),
        w2.T.astype(w_dtype),                      # (Cmid, C) pre-transposed
        b2.reshape(1, C).astype(jnp.float32),
    )

    # ---- Stage 2: HBM-bandwidth-bound gating pass over row-flattened x ----
    x_rows = x.reshape(rows, HW)                   # free (contiguous) reshape
    gate_rows = gate.reshape(rows, 1)

    row_tile, hw_tile = _pick_tiles(rows, HW, x.dtype.itemsize, budget)
    grid = (pl.cdiv(rows, row_tile), pl.cdiv(HW, hw_tile))

    cost = pl.CostEstimate(
        flops=x.size,
        transcendentals=0,
        bytes_accessed=2 * x.size * x.dtype.itemsize + rows * x.dtype.itemsize,
    )

    # TODO(synk): for tiny-HW late SE blocks, fusing stage 1 into stage 2 (gate
    # computed under pl.when(s == 0) into VMEM scratch) would drop one launch.
    out_rows = pl.pallas_call(
        _apply_gate_kernel,
        out_shape=jax.ShapeDtypeStruct((rows, HW), x.dtype),
        grid_spec=pltpu.PrefetchScalarGridSpec(
            num_scalar_prefetch=0,
            grid=grid,
            in_specs=[
                pl.BlockSpec((row_tile, 1), lambda r, s: (r, 0)),         # gate
                pl.BlockSpec((row_tile, hw_tile), lambda r, s: (r, s)),   # x
            ],
            out_specs=pl.BlockSpec((row_tile, hw_tile), lambda r, s: (r, s)),
        ),
        compiler_params=pltpu.CompilerParams(
            dimension_semantics=("parallel", "parallel"),
            vmem_limit_bytes=vmem_limit,
        ),
        cost_estimate=cost,
    )(gate_rows, x_rows)

    return out_rows.reshape(B, C, H, W)


def se_layer_ref(x, x_se, w1, b1, w2, b2):
    """Pure-JAX reference matching the PyTorch forward."""
    B, C, H, W = x.shape
    se = x_se.reshape(B, C)
    h = jnp.maximum(se @ w1.T + b1, 0.0)
    g = jax.nn.sigmoid(h @ w2.T + b2)
    return x * g[:, :, None, None].astype(x.dtype)


if __name__ == "__main__":
    key = jax.random.PRNGKey(0)
    k_x, k_se, k_w1, k_b1, k_w2, k_b2 = jax.random.split(key, 6)

    B, C, H, W = 2, 4, 16, 16
    x = jax.random.normal(k_x, (B, C, H, W), dtype=jnp.float32)
    x_se = jax.random.normal(k_se, (B, C, 1, 1), dtype=jnp.float32)

    # Module as given uses Conv2d(C, C, 1) for both convs (no reduction ratio),
    # with the trailing 1x1 kernel dims squeezed away.
    w1 = jax.random.normal(k_w1, (C, C), dtype=jnp.float32) * 0.1
    b1 = jax.random.normal(k_b1, (C,), dtype=jnp.float32) * 0.1
    w2 = jax.random.normal(k_w2, (C, C), dtype=jnp.float32) * 0.1
    b2 = jax.random.normal(k_b2, (C,), dtype=jnp.float32) * 0.1

    out = se_layer(x, x_se, w1, b1, w2, b2)
    out = jax.block_until_ready(out)

    ref = se_layer_ref(x, x_se, w1, b1, w2, b2)
    assert out.shape == (B, C, H, W)
    assert jnp.allclose(out, ref, atol=1e-5, rtol=1e-5), "mismatch vs reference"

    print("KERNEL_OK")
</pallas_src>

<mosaic_0001>
module attributes {stable_mosaic.version = 11 : i64} {
  func.func @_se_gate_kernel(%arg0: memref<2x4xf32, #tpu.memory_space<vmem>>, %arg1: memref<4x4xf32, #tpu.memory_space<vmem>>, %arg2: memref<1x4xf32, #tpu.memory_space<vmem>>, %arg3: memref<4x4xf32, #tpu.memory_space<vmem>>, %arg4: memref<1x4xf32, #tpu.memory_space<vmem>>, %arg5: memref<2x4xf32, #tpu.memory_space<vmem>>) attributes {dimension_semantics = [], scalar_prefetch = 0 : i64, scratch_operands = 0 : i64, tpu.core_type = #tpu.core_type<tc>} {
    %c0 = arith.constant 0 : index
    %c0_0 = arith.constant 0 : index
    %0 = vector.load %arg0[%c0, %c0_0] : memref<2x4xf32, #tpu.memory_space<vmem>>, vector<2x4xf32>
    %c0_1 = arith.constant 0 : index
    %c0_2 = arith.constant 0 : index
    %1 = vector.load %arg1[%c0_1, %c0_2] : memref<4x4xf32, #tpu.memory_space<vmem>>, vector<4x4xf32>
    %cst = arith.constant dense<0.000000e+00> : vector<2x4xf32>
    %2 = tpu.matmul %0, %1, %cst {dimension_numbers = #tpu.dot_dimension_numbers<[1], [0], [0], [1], [0, 0, 1, 1], [], []>} : vector<2x4xf32>, vector<4x4xf32>, vector<2x4xf32> -> vector<2x4xf32>
    %c0_3 = arith.constant 0 : index
    %c0_4 = arith.constant 0 : index
    %3 = vector.load %arg2[%c0_3, %c0_4] : memref<1x4xf32, #tpu.memory_space<vmem>>, vector<1x4xf32>
    %4 = vector.broadcast %3 : vector<1x4xf32> to vector<2x4xf32>
    %5 = arith.addf %2, %4 : vector<2x4xf32>
    %cst_5 = arith.constant 0.000000e+00 : f32
    %6 = vector.broadcast %cst_5 : f32 to vector<2x4xf32>
    %7 = arith.maximumf %5, %6 : vector<2x4xf32>
    %c0_6 = arith.constant 0 : index
    %c0_7 = arith.constant 0 : index
    %8 = vector.load %arg3[%c0_6, %c0_7] : memref<4x4xf32, #tpu.memory_space<vmem>>, vector<4x4xf32>
    %cst_8 = arith.constant dense<0.000000e+00> : vector<2x4xf32>
    %9 = tpu.matmul %7, %8, %cst_8 {dimension_numbers = #tpu.dot_dimension_numbers<[1], [0], [0], [1], [0, 0, 1, 1], [], []>} : vector<2x4xf32>, vector<4x4xf32>, vector<2x4xf32> -> vector<2x4xf32>
    %c0_9 = arith.constant 0 : index
    %c0_10 = arith.constant 0 : index
    %10 = vector.load %arg4[%c0_9, %c0_10] : memref<1x4xf32, #tpu.memory_space<vmem>>, vector<1x4xf32>
    %11 = vector.broadcast %10 : vector<1x4xf32> to vector<2x4xf32>
    %12 = arith.addf %9, %11 : vector<2x4xf32>
    %13 = arith.negf %12 : vector<2x4xf32>
    %14 = math.exp %13 : vector<2x4xf32>
    %cst_11 = arith.constant 1.000000e+00 : f32
    %15 = vector.broadcast %cst_11 : f32 to vector<2x4xf32>
    %16 = arith.addf %15, %14 : vector<2x4xf32>
    %17 = arith.divf %15, %16 : vector<2x4xf32>
    %c0_12 = arith.constant 0 : index
    %c0_13 = arith.constant 0 : index
    %18 = vector.load %arg5[%c0_12, %c0_13] : memref<2x4xf32, #tpu.memory_space<vmem>>, vector<2x4xf32>
    tpu.vector_store %arg5[%c0_12, %c0_13], %17 {strides = array<i32>} : memref<2x4xf32, #tpu.memory_space<vmem>>, vector<2x4xf32>,
    return
  }
}

</mosaic_0001>

<bundles_post_ra>
// kernel: tpu_custom_call.1
= control target key start
LH: loop header
LB: loop body
LE: loop exit
PB: predicated region body
PF: predicated region fallthrough
CT: control target
= control target key end

     0   :  { %10 = vsyncpa [#allocation3], 0  ;;  %s336_s0 = inlined_call_operand.hbm [shape: f32[2,4], index: 0, kind: input, shape index: {}]   ;;  %s337_s1 = inlined_call_operand.hbm [shape: f32[4,4], index: 1, kind: input, shape index: {}]   ;;  %s338_s2 = inlined_call_operand.vmem [shape: f32[1,4], index: 2, kind: input, shape index: {}]   ;;  %s339_s3 = inlined_call_operand.hbm [shape: f32[4,4], index: 3, kind: input, shape index: {}]   ;;  %s340_s4 = inlined_call_operand.vmem [shape: f32[1,4], index: 4, kind: input, shape index: {}]   ;;  %s341_s5 = inlined_call_operand.hbm [shape: f32[2,4], index: 5, kind: output, shape index: {}]  }
   0x1   :  { %11 = vsyncpa [#allocation6], 0  ;;  %s29_s20 = sshll.u32 %s337_s1, 4  ;;  %s30_s20 = int_to_ptr.hbm [resolvable:$true] %s29_s20 }
   0x2   :  { %12 = vsyncpa [#allocation4], 0  ;;  %s284_s21 = smov [#allocation5]   ;;  %s18_s25 = sshll.u32 %s336_s0, 4  ;;  %s19_s25 = int_to_ptr.hbm [resolvable:$true] %s18_s25 }
   0x3   :  { %s31_s22 = sshll.u32 %s284_s21, 4  ;;  %s285_s26 = smov [#allocation2]   ;;  %s32_s22 = int_to_ptr.vmem [resolvable:$true] %s31_s22 }
   0x4   :  { %34 = dma.hbm_to_vmem [thread:$0]  %s30_s20, 64, %s32_s22, [#allocation6]  }
   0x5   :  { %s20_s27 = sshll.u32 %s285_s26, 4  ;;  %s42_s30 = sshll.u32 %s339_s3, 4  ;;  %s21_s27 = int_to_ptr.vmem [resolvable:$true] %s20_s27  ;;  %s43_s30 = int_to_ptr.hbm [resolvable:$true] %s42_s30 }
   0x6   :  { %23 = dma.hbm_to_vmem [thread:$0]  %s19_s25, 32, %s21_s27, [#allocation3]  }
   0x7   :  { %s286_s1 = smov [#allocation7]  }
   0x8   :  { %s44_s6 = sshll.u32 %s286_s1, 4  ;;  %s45_s6 = int_to_ptr.vmem [resolvable:$true] %s44_s6 }
   0x9   :  { %47 = dma.hbm_to_vmem [thread:$0]  %s43_s30, 64, %s45_s6, [#allocation6]  }
   0xa   :  { %278 = dma.done.wait [#allocation3], 32  }
   0xb   :  { %279 = vsyncadd [#allocation3], 4294967264 }
   0xc   :  { %280 = dma.done.wait [#allocation6], 128  }
   0xd   :  { %281 = vsyncadd [#allocation6], 4294967168  ;;  %vm72_vm0 = vcmask 1043456   ;;  %vm68_vm1 = vcmask 31744   ;;  %v63_v0 = vld [vmem:[#allocation5] sm:$0xf] }
   0xe   :  { %v62_v1 = vld [vmem:[#allocation2] sm:$0x3]  ;;  %167 = vmatpush.msk.msra.mxu0 %vm72_vm0, %v63_v0  ;;  %v97_v2 = vld [vmem:[#allocation7] sm:$0xf]  ;;  %vm147_vm5 = vcmask 25600  }
   0xf   :  { %168 = vmatmul.msk.f32.vlgmr.msra.gmra.mxu0 %vm68_vm1, %v62_v1  ;;  %169 = vmatpush.msk.msra.mxu1 %vm72_vm0, %v97_v2  ;;  %v176_v3 = vld [vmem:[%s338_s2] ss:$0 sm:$0xff]  ;;  %s287_s2 = smov [#allocation8]  }
  0x10   :  { %v177_v7 = vld [vmem:[%s340_s4] ss:$0 sm:$0xff]  ;;  %s154_s9 = sshll.u32 %s287_s2, 4  ;;  %s156_s4 = sshll.u32 %s341_s5, 4  ;;  %s155_s9 = int_to_ptr.vmem [resolvable:$true] %s154_s9  ;;  %s157_s4 = int_to_ptr.hbm [resolvable:$true] %s156_s4 }
  0x8c   :  { %v93_v4 = vpop.f32.mrf.mxu0 }
  0x8d   :  { %v94_v5 = vadd.f32 %v176_v3, %v93_v4 }
  0x8f   :  { %v96_v6 = vmax.f32 %v94_v5, 0.0 }
  0x91   :  { %170 = vmatmul.msk.f32.vlgmr.msra.gmra.mxu1 %vm68_vm1, %v96_v6 }
 0x10e   :  { %v125_v8 = vpop.f32.mrf.mxu1 }
 0x10f   :  { %v126_v9 = vadd.f32 %v177_v7, %v125_v8 }
 0x111   :  { %v171_v10 = vmul.f32 -1.442695, %v126_v9 }
 0x113   :  { %178 = vpow2.f32 %v171_v10 }
 0x119   :  { %v179_v11 = vpop.eup %178 }
 0x11a   :  { %v131_v12 = vadd.f32 1.0, %v179_v11 }
 0x11c   :  { %180 = vrcp.f32 %v131_v12  ;;  %v143_v16 = vand.u32 2147483648, %v131_v12  ;;  %v141_v18 = vand.u32 2147483647, %v131_v12  ;;  %vm137_vm3 = vweird.f32 %v131_v12 }
 0x11e   :  { %v144_v20 = vor.u32 1.1754944e-38, %v143_v16  ;;  %vm142_vm6 = vcmp.eq.f32.partialorder %v141_v18, 8.507059e+37 }
 0x122   :  { %v181_v13 = vpop.eup %180 }
 0x123   :  { %v133_v14 = vmul.f32 %v181_v13, %v131_v12  ;;  %vm138_vm2 = vweird.f32 %v181_v13 }
 0x124   :  { %vm139_vm4 = vmor %vm137_vm3, %vm138_vm2 }
 0x125   :  { %v134_v15 = vsub.f32 1.0, %v133_v14 }
 0x127   :  { %v135_v17 = vmul.f32 %v181_v13, %v134_v15 }
 0x129   :  { %v136_v19 = vadd.f32 %v181_v13, %v135_v17 }
 0x12b   :  { %v140_v21 = vsel %vm139_vm4, %v181_v13, %v136_v19 }
 0x12c   :  { %v145_v22 = vsel %vm142_vm6, %v144_v20, %v140_v21 }
 0x12d   :  { %148 = vst.msk [vmem:[#allocation8] sm:$0x3] %vm147_vm5, %v145_v22 }
 0x12e   :  { %159 = dma.vmem_to_hbm [thread:$0]  %s155_s9, 32, %s157_s4, [#allocation4]  }
 0x12f   :  { %282 = dma.done.wait [#allocation4], 32  }
 0x130   :  { %283 = vsyncadd [#allocation4], 4294967264 }
 0x131   :  { %164 = vsyncpa [#allocation3], 1 }
 0x132   :  { %165 = vsyncpa [#allocation6], 1 }
 0x133   :  { %166 = vsyncpa [#allocation4], 1 }

</bundles_post_ra>
